<compile_context>
chip_gen: v6e
topology: v6e:2x2x1
jax: 0.10.0
libtpu: 0.0.40
codegen_flags: <defaults>
</compile_context>

<pallas_src>
import functools

import jax
import jax.numpy as jnp
from jax.experimental import pallas as pl
from jax.experimental.pallas import tpu as pltpu

# Logical hidden sizes (PyTorch module).
H1, H2, H3 = 500, 300, 250
# Lane/MXU-aligned padded sizes (zero-padded -> numerically identical).
H1P, H2P, H3P = 512, 384, 256
LANE = 128
SUBLANE_BF16 = 16   # bf16 packs 16 sublanes per vreg


def _round_up(n, m):
    return (n + m - 1) // m * m


def _mlp_kernel(x_ref, w1_ref, b1_ref, w2_ref, b2_ref,
                w3_ref, b3_ref, w4_ref, b4_ref, out_ref):
    # x arrives f32 at its natural feature width; the bf16 cast is a VPU op
    # hidden under the MXU (no separate pad/cast HLO in the wrapper).
    h = jnp.dot(x_ref[...].astype(jnp.bfloat16), w1_ref[...],
                preferred_element_type=jnp.float32)
    # Bias + ReLU in f32 on the VPU; downcast fused into the ReLU so the
    # (tb, hidden) intermediate lives/spills as bf16, not f32.
    h = jnp.maximum(h + b1_ref[...], 0.0).astype(jnp.bfloat16)

    h = jnp.dot(h, w2_ref[...], preferred_element_type=jnp.float32)
    h = jnp.maximum(h + b2_ref[...], 0.0).astype(jnp.bfloat16)

    h = jnp.dot(h, w3_ref[...], preferred_element_type=jnp.float32)
    h = jnp.maximum(h + b3_ref[...], 0.0).astype(jnp.bfloat16)

    h = jnp.dot(h, w4_ref[...], preferred_element_type=jnp.float32)
    out_ref[...] = (h + b4_ref[...]).astype(out_ref.dtype)


def init_params(key, n_states, n_actions):
    """Matches nn.init.normal_(w, 0.0, 0.1), nn.init.constant_(b, 0.1).

    Weights are stored [in_features, out_features] (transpose of PyTorch)."""
    ks = jax.random.split(key, 4)
    dims = [(n_states, H1), (H1, H2), (H2, H3), (H3, n_actions)]
    params = []
    for k, (din, dout) in zip(ks, dims):
        w = 0.1 * jax.random.normal(k, (din, dout), dtype=jnp.float32)
        b = jnp.full((dout,), 0.1, dtype=jnp.float32)
        params.extend([w, b])
    return tuple(params)


def prepare_params(params):
    """One-time prep: zero-pad hidden dims to aligned sizes, cast weights to bf16.

    Padding is all zeros (including biases), so padded lanes stay exactly 0
    through ReLU and never leak into downstream layers. w1 keeps its natural
    input width (no din padding needed)."""
    w1, b1, w2, b2, w3, b3, w4, b4 = params
    n_states = w1.shape[0]
    n_actions = w4.shape[1]
    dop = _round_up(max(n_actions, LANE), LANE)

    def pad_w(w, din_p, dout_p):
        out = jnp.zeros((din_p, dout_p), jnp.float32)
        out = out.at[:w.shape[0], :w.shape[1]].set(w)
        return out.astype(jnp.bfloat16)

    def pad_b(b, dout_p):
        out = jnp.zeros((1, dout_p), jnp.float32)   # pad bias with 0.0, not 0.1
        return out.at[0, :b.shape[0]].set(b)

    return (pad_w(w1, n_states, H1P), pad_b(b1, H1P),
            pad_w(w2, H1P, H2P),      pad_b(b2, H2P),
            pad_w(w3, H2P, H3P),      pad_b(b3, H3P),
            pad_w(w4, H3P, dop),      pad_b(b4, dop))


@functools.partial(jax.jit, static_argnames=("n_actions", "block_b"))
def net_forward(x, padded_params, n_actions, block_b=1024):
    """x: [B, n_states] f32 -> [B, n_actions] f32 (uses prepare_params output)."""
    w1, b1, w2, b2, w3, b3, w4, b4 = padded_params
    batch, n_states = x.shape
    dop = w4.shape[1]

    # Batch tiling:
    #   * tiny batch (<=16): single full-batch tile, zero extra HLOs.
    #   * otherwise: tile is a multiple of 16 (bf16 sublane pack), capped at
    #     block_b and at ceil(batch/2) so the grid has >=2 parallel steps
    #     (spans both TensorCores on v7x; no-op on v5e/v6e).
    if batch <= SUBLANE_BF16:
        tb = batch
        b_pad = batch
    else:
        b_pad16 = _round_up(batch, SUBLANE_BF16)
        tb = min(block_b, _round_up(b_pad16 // 2, SUBLANE_BF16))
        b_pad = _round_up(batch, tb)

    x_in = x
    if b_pad != batch:
        # Row-only pad (no lane widening, no dtype cast) when batch is ragged.
        x_in = jnp.zeros((b_pad, n_states), x.dtype).at[:batch].set(x)

    grid = (b_pad // tb,)
    flops = 2 * b_pad * (n_states * H1P + H1P * H2P + H2P * H3P + H3P * dop)
    weight_bytes = 2 * (w1.size + w2.size + w3.size + w4.size)
    bias_bytes = 4 * (b1.size + b2.size + b3.size + b4.size)
    bytes_accessed = (x_in.dtype.itemsize * x_in.size + weight_bytes
                      + bias_bytes + 4 * b_pad * dop)

    def wspec(shape):
        # Constant index_map -> weight/bias blocks are DMA'd once and stay
        # resident in VMEM across all grid steps.
        return pl.BlockSpec(shape, lambda i: (0, 0))

    out = pl.pallas_call(
        _mlp_kernel,
        out_shape=jax.ShapeDtypeStruct((b_pad, dop), jnp.float32),
        grid=grid,
        in_specs=[
            pl.BlockSpec((tb, n_states), lambda i: (i, 0)),
            wspec(w1.shape), wspec(b1.shape),
            wspec(w2.shape), wspec(b2.shape),
            wspec(w3.shape), wspec(b3.shape),
            wspec(w4.shape), wspec(b4.shape),
        ],
        out_specs=pl.BlockSpec((tb, dop), lambda i: (i, 0)),
        compiler_params=pltpu.CompilerParams(
            dimension_semantics=("parallel",)),
        cost_estimate=pl.CostEstimate(
            flops=flops, transcendentals=0, bytes_accessed=bytes_accessed),
    )(x_in, w1, b1, w2, b2, w3, b3, w4, b4)

    return out[:batch, :n_actions]


def _reference_f32(x, params):
    """Pure-f32 reference of the original module."""
    w1, b1, w2, b2, w3, b3, w4, b4 = params
    h = jnp.maximum(x @ w1 + b1, 0.0)
    h = jnp.maximum(h @ w2 + b2, 0.0)
    h = jnp.maximum(h @ w3 + b3, 0.0)
    return h @ w4 + b4


def _reference_bf16(x, params):
    """Reference emulating the kernel's bf16-in / f32-accumulate numerics."""
    w1, b1, w2, b2, w3, b3, w4, b4 = params

    def q(a):  # quantize to bf16, compute in f32
        return a.astype(jnp.bfloat16).astype(jnp.float32)

    h = jnp.maximum(q(x) @ q(w1) + b1, 0.0)
    h = jnp.maximum(q(h) @ q(w2) + b2, 0.0)
    h = jnp.maximum(q(h) @ q(w3) + b3, 0.0)
    return q(h) @ q(w4) + b4


if __name__ == "__main__":
    n_states, n_actions, batch = 32, 8, 2

    key = jax.random.PRNGKey(0)
    k_x, k_p = jax.random.split(key)
    x = jax.random.normal(k_x, (batch, n_states), dtype=jnp.float32)
    params = init_params(k_p, n_states, n_actions)
    padded_params = prepare_params(params)

    # Deployment-shape path (single tile, no padding HLO).
    out = net_forward(x, padded_params, n_actions)
    jax.block_until_ready(out)
    assert out.shape == (batch, n_actions)

    # Tight check against a bf16-emulating reference (verifies kernel math).
    ref_q = _reference_bf16(x, params)
    assert jnp.allclose(out, ref_q, atol=1e-3, rtol=1e-3), \
        float(jnp.max(jnp.abs(out - ref_q)))

    # Loose check against the full-f32 module semantics (bf16 rounding only).
    ref = _reference_f32(x, params)
    assert jnp.allclose(out, ref, atol=1e-1, rtol=1e-1), \
        float(jnp.max(jnp.abs(out - ref)))

    # Also exercise the multi-tile (padded, 2-step grid) path.
    xb = jax.random.normal(k_x, (40, n_states), dtype=jnp.float32)
    outb = net_forward(xb, padded_params, n_actions)
    jax.block_until_ready(outb)
    assert outb.shape == (40, n_actions)
    refb_q = _reference_bf16(xb, params)
    assert jnp.allclose(outb, refb_q, atol=1e-3, rtol=1e-3), \
        float(jnp.max(jnp.abs(outb - refb_q)))

    print("KERNEL_OK")
</pallas_src>

<mosaic_0001>
module attributes {stable_mosaic.version = 11 : i64} {
  func.func @_mlp_kernel(%arg0: i32, %arg1: memref<2x32xf32, #tpu.memory_space<vmem>>, %arg2: memref<32x512xbf16, #tpu.memory_space<vmem>>, %arg3: memref<1x512xf32, #tpu.memory_space<vmem>>, %arg4: memref<512x384xbf16, #tpu.memory_space<vmem>>, %arg5: memref<1x384xf32, #tpu.memory_space<vmem>>, %arg6: memref<384x256xbf16, #tpu.memory_space<vmem>>, %arg7: memref<1x256xf32, #tpu.memory_space<vmem>>, %arg8: memref<256x128xbf16, #tpu.memory_space<vmem>>, %arg9: memref<1x128xf32, #tpu.memory_space<vmem>>, %arg10: memref<2x128xf32, #tpu.memory_space<vmem>>) attributes {dimension_semantics = [#tpu.dimension_semantics<parallel>], iteration_bounds = array<i64: 1>, scalar_prefetch = 0 : i64, scratch_operands = 0 : i64, tpu.core_type = #tpu.core_type<tc>, window_params = [{transform_indices = @transform_0, window_bounds = array<i64: 2, 32>}, {pipeline_mode = #tpu.pipeline_mode<synchronous>, transform_indices = @transform_1, window_bounds = array<i64: 32, 512>}, {pipeline_mode = #tpu.pipeline_mode<synchronous>, transform_indices = @transform_2, window_bounds = array<i64: 1, 512>}, {pipeline_mode = #tpu.pipeline_mode<synchronous>, transform_indices = @transform_3, window_bounds = array<i64: 512, 384>}, {pipeline_mode = #tpu.pipeline_mode<synchronous>, transform_indices = @transform_4, window_bounds = array<i64: 1, 384>}, {pipeline_mode = #tpu.pipeline_mode<synchronous>, transform_indices = @transform_5, window_bounds = array<i64: 384, 256>}, {pipeline_mode = #tpu.pipeline_mode<synchronous>, transform_indices = @transform_6, window_bounds = array<i64: 1, 256>}, {pipeline_mode = #tpu.pipeline_mode<synchronous>, transform_indices = @transform_7, window_bounds = array<i64: 256, 128>}, {pipeline_mode = #tpu.pipeline_mode<synchronous>, transform_indices = @transform_8, window_bounds = array<i64: 1, 128>}, {transform_indices = @transform_9, window_bounds = array<i64: 2, 128>}]} {
    %c0 = arith.constant 0 : index
    %c0_0 = arith.constant 0 : index
    %0 = vector.load %arg1[%c0, %c0_0] : memref<2x32xf32, #tpu.memory_space<vmem>>, vector<2x32xf32>
    %1 = arith.truncf %0 : vector<2x32xf32> to vector<2x32xbf16>
    %c0_1 = arith.constant 0 : index
    %c0_2 = arith.constant 0 : index
    %2 = vector.load %arg2[%c0_1, %c0_2] : memref<32x512xbf16, #tpu.memory_space<vmem>>, vector<32x512xbf16>
    %cst = arith.constant dense<0.000000e+00> : vector<2x512xf32>
    %3 = tpu.matmul %1, %2, %cst {dimension_numbers = #tpu.dot_dimension_numbers<[1], [0], [0], [1], [0, 0, 1, 1], [], []>} : vector<2x32xbf16>, vector<32x512xbf16>, vector<2x512xf32> -> vector<2x512xf32>
    %c0_3 = arith.constant 0 : index
    %c0_4 = arith.constant 0 : index
    %4 = vector.load %arg3[%c0_3, %c0_4] : memref<1x512xf32, #tpu.memory_space<vmem>>, vector<1x512xf32>
    %5 = vector.broadcast %4 : vector<1x512xf32> to vector<2x512xf32>
    %6 = arith.addf %3, %5 : vector<2x512xf32>
    %cst_5 = arith.constant 0.000000e+00 : f32
    %7 = vector.broadcast %cst_5 : f32 to vector<2x512xf32>
    %8 = arith.maximumf %6, %7 : vector<2x512xf32>
    %9 = arith.truncf %8 : vector<2x512xf32> to vector<2x512xbf16>
    %c0_6 = arith.constant 0 : index
    %c0_7 = arith.constant 0 : index
    %10 = vector.load %arg4[%c0_6, %c0_7] : memref<512x384xbf16, #tpu.memory_space<vmem>>, vector<512x384xbf16>
    %cst_8 = arith.constant dense<0.000000e+00> : vector<2x384xf32>
    %11 = tpu.matmul %9, %10, %cst_8 {dimension_numbers = #tpu.dot_dimension_numbers<[1], [0], [0], [1], [0, 0, 1, 1], [], []>} : vector<2x512xbf16>, vector<512x384xbf16>, vector<2x384xf32> -> vector<2x384xf32>
    %c0_9 = arith.constant 0 : index
    %c0_10 = arith.constant 0 : index
    %12 = vector.load %arg5[%c0_9, %c0_10] : memref<1x384xf32, #tpu.memory_space<vmem>>, vector<1x384xf32>
    %13 = vector.broadcast %12 : vector<1x384xf32> to vector<2x384xf32>
    %14 = arith.addf %11, %13 : vector<2x384xf32>
    %cst_11 = arith.constant 0.000000e+00 : f32
    %15 = vector.broadcast %cst_11 : f32 to vector<2x384xf32>
    %16 = arith.maximumf %14, %15 : vector<2x384xf32>
    %17 = arith.truncf %16 : vector<2x384xf32> to vector<2x384xbf16>
    %c0_12 = arith.constant 0 : index
    %c0_13 = arith.constant 0 : index
    %18 = vector.load %arg6[%c0_12, %c0_13] : memref<384x256xbf16, #tpu.memory_space<vmem>>, vector<384x256xbf16>
    %cst_14 = arith.constant dense<0.000000e+00> : vector<2x256xf32>
    %19 = tpu.matmul %17, %18, %cst_14 {dimension_numbers = #tpu.dot_dimension_numbers<[1], [0], [0], [1], [0, 0, 1, 1], [], []>} : vector<2x384xbf16>, vector<384x256xbf16>, vector<2x256xf32> -> vector<2x256xf32>
    %c0_15 = arith.constant 0 : index
    %c0_16 = arith.constant 0 : index
    %20 = vector.load %arg7[%c0_15, %c0_16] : memref<1x256xf32, #tpu.memory_space<vmem>>, vector<1x256xf32>
    %21 = vector.broadcast %20 : vector<1x256xf32> to vector<2x256xf32>
    %22 = arith.addf %19, %21 : vector<2x256xf32>
    %cst_17 = arith.constant 0.000000e+00 : f32
    %23 = vector.broadcast %cst_17 : f32 to vector<2x256xf32>
    %24 = arith.maximumf %22, %23 : vector<2x256xf32>
    %25 = arith.truncf %24 : vector<2x256xf32> to vector<2x256xbf16>
    %c0_18 = arith.constant 0 : index
    %c0_19 = arith.constant 0 : index
    %26 = vector.load %arg8[%c0_18, %c0_19] : memref<256x128xbf16, #tpu.memory_space<vmem>>, vector<256x128xbf16>
    %cst_20 = arith.constant dense<0.000000e+00> : vector<2x128xf32>
    %27 = tpu.matmul %25, %26, %cst_20 {dimension_numbers = #tpu.dot_dimension_numbers<[1], [0], [0], [1], [0, 0, 1, 1], [], []>} : vector<2x256xbf16>, vector<256x128xbf16>, vector<2x128xf32> -> vector<2x128xf32>
    %c0_21 = arith.constant 0 : index
    %c0_22 = arith.constant 0 : index
    %28 = vector.load %arg9[%c0_21, %c0_22] : memref<1x128xf32, #tpu.memory_space<vmem>>, vector<1x128xf32>
    %29 = vector.broadcast %28 : vector<1x128xf32> to vector<2x128xf32>
    %30 = arith.addf %27, %29 : vector<2x128xf32>
    %c0_23 = arith.constant 0 : index
    %c0_24 = arith.constant 0 : index
    %31 = vector.load %arg10[%c0_23, %c0_24] : memref<2x128xf32, #tpu.memory_space<vmem>>, vector<2x128xf32>
    tpu.vector_store %arg10[%c0_23, %c0_24], %30 {strides = array<i32>} : memref<2x128xf32, #tpu.memory_space<vmem>>, vector<2x128xf32>,
    return
  }
  func.func @transform_0(%arg0: i32) -> (i32, i32) {
    %c0_i32 = arith.constant 0 : i32
    %c0_i32_0 = arith.constant 0 : i32
    return %arg0, %c0_i32 : i32, i32
  }
  func.func @transform_1(%arg0: i32) -> (i32, i32) {
    %c0_i32 = arith.constant 0 : i32
    %c0_i32_0 = arith.constant 0 : i32
    %c0_i32_1 = arith.constant 0 : i32
    return %c0_i32, %c0_i32_0 : i32, i32
  }
  func.func @transform_2(%arg0: i32) -> (i32, i32) {
    %c0_i32 = arith.constant 0 : i32
    %c0_i32_0 = arith.constant 0 : i32
    %c0_i32_1 = arith.constant 0 : i32
    return %c0_i32, %c0_i32_0 : i32, i32
  }
  func.func @transform_3(%arg0: i32) -> (i32, i32) {
    %c0_i32 = arith.constant 0 : i32
    %c0_i32_0 = arith.constant 0 : i32
    %c0_i32_1 = arith.constant 0 : i32
    return %c0_i32, %c0_i32_0 : i32, i32
  }
  func.func @transform_4(%arg0: i32) -> (i32, i32) {
    %c0_i32 = arith.constant 0 : i32
    %c0_i32_0 = arith.constant 0 : i32
    %c0_i32_1 = arith.constant 0 : i32
    return %c0_i32, %c0_i32_0 : i32, i32
  }
  func.func @transform_5(%arg0: i32) -> (i32, i32) {
    %c0_i32 = arith.constant 0 : i32
    %c0_i32_0 = arith.constant 0 : i32
    %c0_i32_1 = arith.constant 0 : i32
    return %c0_i32, %c0_i32_0 : i32, i32
  }
  func.func @transform_6(%arg0: i32) -> (i32, i32) {
    %c0_i32 = arith.constant 0 : i32
    %c0_i32_0 = arith.constant 0 : i32
    %c0_i32_1 = arith.constant 0 : i32
    return %c0_i32, %c0_i32_0 : i32, i32
  }
  func.func @transform_7(%arg0: i32) -> (i32, i32) {
    %c0_i32 = arith.constant 0 : i32
    %c0_i32_0 = arith.constant 0 : i32
    %c0_i32_1 = arith.constant 0 : i32
    return %c0_i32, %c0_i32_0 : i32, i32
  }
  func.func @transform_8(%arg0: i32) -> (i32, i32) {
    %c0_i32 = arith.constant 0 : i32
    %c0_i32_0 = arith.constant 0 : i32
    %c0_i32_1 = arith.constant 0 : i32
    return %c0_i32, %c0_i32_0 : i32, i32
  }
  func.func @transform_9(%arg0: i32) -> (i32, i32) {
    %c0_i32 = arith.constant 0 : i32
    %c0_i32_0 = arith.constant 0 : i32
    return %arg0, %c0_i32 : i32, i32
  }
}

</mosaic_0001>

<bundles_post_ra>
// kernel: net_forward.1
= control target key start
LH: loop header
LB: loop body
LE: loop exit
PB: predicated region body
PF: predicated region fallthrough
CT: control target
= control target key end

     0   :  { %14 = vsyncpa [#allocation3], 0  ;;  %s2441_s0 = inlined_call_operand.hbm [shape: f32[2,32], index: 0, kind: input, shape index: {}]   ;;  %s2442_s1 = inlined_call_operand.hbm [shape: bf16[32,512], index: 1, kind: input, shape index: {}]   ;;  %s2443_s2 = inlined_call_operand.hbm [shape: f32[1,512], index: 2, kind: input, shape index: {}]   ;;  %s2444_s3 = inlined_call_operand.hbm [shape: bf16[512,384], index: 3, kind: input, shape index: {}]   ;;  %s2445_s4 = inlined_call_operand.vmem [shape: f32[1,384], index: 4, kind: input, shape index: {}]   ;;  %s2446_s5 = inlined_call_operand.hbm [shape: bf16[384,256], index: 5, kind: input, shape index: {}]   ;;  %s2447_s6 = inlined_call_operand.vmem [shape: f32[1,256], index: 6, kind: input, shape index: {}]   ;;  %s2448_s7 = inlined_call_operand.hbm [shape: bf16[256,128], index: 7, kind: input, shape index: {}]   ;;  %s2449_s8 = inlined_call_operand.vmem [shape: f32[1,128], index: 8, kind: input, shape index: {}]   ;;  %s2450_s9 = inlined_call_operand.hbm [shape: f32[2,128], index: 9, kind: output, shape index: {}]  }
   0x1   :  { %15 = vsyncpa [#allocation6], 0 }
   0x2   :  { %16 = vsyncpa [#allocation9], 0 }
   0x3   :  { %17 = vsyncpa [#allocation12], 0 }
   0x4   :  { %18 = vsyncpa [#allocation4], 0  ;;  %s2314_s30 = smov [#allocation5]  }
   0x5   :  { %s34_s10 = sshll.u32 %s2314_s30, 4  ;;  %s35_s10 = int_to_ptr.vmem [resolvable:$true] %s34_s10 }
   0x6   :  { %s2172_s11 = scalar_lea.vmem %s35_s10, 1024  ;;  %p2177_p1 = scmp.lt.s32.totalorder %s35_s10, %s35_s10 }
   0x7   :  { %p2173_p0 = scmp.ne.s32.totalorder %s35_s10, %s2172_s11  ;;  %p2178_p2 = scmp.lt.s32.totalorder %s2172_s11, %s2172_s11 }
   0x9   :  { %p2179_p3 = por %p2178_p2, %p2177_p1 }
   0xb   :  { %p2180_p4 = pnand %p2179_p3, %p2173_p0 }
   0xd   :  { %2183 = shalt.err (!%p2180_p4)
}
   0xe   :  { %s2315_s12 = smov 256   ;;  %s2316_s13 = smov 16  }
   0xf   :  { %40 = dma.hbm_to_vmem [thread:$0]  %s2442_s1, 1024, %s35_s10, [#allocation6], %s2315_s12, %s2315_s12, %s2316_s13  }
  0x10   :  { %s2317_s16 = smov [#allocation8]  }
  0x11   :  { %s56_s17 = sshll.u32 %s2317_s16, 4  ;;  %s57_s17 = int_to_ptr.vmem [resolvable:$true] %s56_s17 }
  0x12   :  { %s2192_s18 = scalar_lea.vmem %s57_s17, 12288  ;;  %p2197_p6 = scmp.lt.s32.totalorder %s57_s17, %s57_s17 }
  0x13   :  { %p2193_p5 = scmp.ne.s32.totalorder %s57_s17, %s2192_s18  ;;  %p2198_p7 = scmp.lt.s32.totalorder %s2192_s18, %s2192_s18 }
  0x15   :  { %p2199_p8 = por %p2198_p7, %p2197_p6 }
  0x17   :  { %p2200_p9 = pnand %p2199_p8, %p2193_p5 }
  0x19   :  { %2203 = shalt.err (!%p2200_p9)
}
  0x1a   :  { %s2318_s19 = smov 192   ;;  %s2319_s20 = smov 12  }
  0x1b   :  { %62 = dma.hbm_to_vmem [thread:$0]  %s2444_s3, 12288, %s57_s17, [#allocation9], %s2318_s19, %s2318_s19, %s2319_s20  }
  0x1c   :  { %s2320_s23 = smov [#allocation2]   ;;  %s2321_s25 = smov [#allocation7]  }
  0x1d   :  { %s25_s24 = sshll.u32 %s2320_s23, 4  ;;  %s47_s1 = sshll.u32 %s2321_s25, 4  ;;  %s26_s24 = int_to_ptr.vmem [resolvable:$true] %s25_s24  ;;  %s48_s1 = int_to_ptr.vmem [resolvable:$true] %s47_s1 }
  0x1e   :  { %s2212_s26 = scalar_lea.vmem %s26_s24, 32  ;;  %p2217_p11 = scmp.lt.s32.totalorder %s26_s24, %s26_s24 }
  0x1f   :  { %p2213_p10 = scmp.ne.s32.totalorder %s26_s24, %s2212_s26  ;;  %p2218_p12 = scmp.lt.s32.totalorder %s2212_s26, %s2212_s26 }
  0x21   :  { %p2219_p13 = por %p2218_p12, %p2217_p11 }
  0x23   :  { %p2220_p0 = pnand %p2219_p13, %p2213_p10 }
  0x25   :  { %2223 = shalt.err (!%p2220_p0)
}
  0x26   :  { %28 = dma.hbm_to_vmem [thread:$0]  %s2441_s0, 32, %s26_s24, [#allocation3]  }
  0x27   :  { %s2232_s29 = scalar_lea.vmem %s48_s1, 64  ;;  %p2237_p2 = scmp.lt.s32.totalorder %s48_s1, %s48_s1 }
  0x28   :  { %p2233_p1 = scmp.ne.s32.totalorder %s48_s1, %s2232_s29  ;;  %p2238_p3 = scmp.lt.s32.totalorder %s2232_s29, %s2232_s29 }
  0x2a   :  { %p2239_p4 = por %p2238_p3, %p2237_p2 }
  0x2c   :  { %p2240_p5 = pnand %p2239_p4, %p2233_p1 }
  0x2e   :  { %2243 = shalt.err (!%p2240_p5)
}
  0x2f   :  { %50 = dma.hbm_to_vmem [thread:$0]  %s2443_s2, 64, %s48_s1, [#allocation6]  }
  0x30   :  { %s2322_s10 = smov [#allocation10]  }
  0x31   :  { %s70_s11 = sshll.u32 %s2322_s10, 4  ;;  %s71_s11 = int_to_ptr.vmem [resolvable:$true] %s70_s11 }
  0x32   :  { %s2252_s12 = scalar_lea.vmem %s71_s11, 6144  ;;  %p2257_p7 = scmp.lt.s32.totalorder %s71_s11, %s71_s11 }
  0x33   :  { %p2253_p6 = scmp.ne.s32.totalorder %s71_s11, %s2252_s12  ;;  %p2258_p8 = scmp.lt.s32.totalorder %s2252_s12, %s2252_s12 }
  0x35   :  { %p2259_p9 = por %p2258_p8, %p2257_p7 }
  0x37   :  { %p2260_p10 = pnand %p2259_p9, %p2253_p6 }
  0x39   :  { %2263 = shalt.err (!%p2260_p10)
}
  0x3a   :  { %s2323_s0 = smov 128   ;;  %s2324_s13 = smov 8  }
  0x3b   :  { %76 = dma.hbm_to_vmem [thread:$0]  %s2446_s5, 6144, %s71_s11, [#allocation9], %s2323_s0, %s2323_s0, %s2324_s13  }
  0x3c   :  { %s2325_s16 = smov [#allocation11]  }
  0x3d   :  { %s84_s17 = sshll.u32 %s2325_s16, 4  ;;  %s85_s17 = int_to_ptr.vmem [resolvable:$true] %s84_s17 }
  0x3e   :  { %s2272_s2 = scalar_lea.vmem %s85_s17, 2048  ;;  %p2277_p12 = scmp.lt.s32.totalorder %s85_s17, %s85_s17 }
  0x3f   :  { %p2273_p11 = scmp.ne.s32.totalorder %s85_s17, %s2272_s2  ;;  %p2278_p13 = scmp.lt.s32.totalorder %s2272_s2, %s2272_s2 }
  0x41   :  { %p2279_p0 = por %p2278_p13, %p2277_p12 }
  0x43   :  { %p2280_p1 = pnand %p2279_p0, %p2273_p11 }
  0x45   :  { %2283 = shalt.err (!%p2280_p1)
}
  0x46   :  { %s2326_s18 = smov 64   ;;  %s2327_s19 = smov 4  }
  0x47   :  { %90 = dma.hbm_to_vmem [thread:$0]  %s2448_s7, 2048, %s85_s17, [#allocation12], %s2326_s18, %s2326_s18, %s2327_s19  }
  0x48   :  { %2304 = dma.done.wait [#allocation3], 32  }
  0x49   :  { %2305 = vsyncadd [#allocation3], 4294967264 }
  0x4a   :  { %2306 = dma.done.wait [#allocation6], 1088  }
  0x4b   :  { %2307 = vsyncadd [#allocation6], 4294966208 }
  0x4c   :  { %2308 = dma.done.wait [#allocation9], 18432  }
  0x4d   :  { %2309 = vsyncadd [#allocation9], 4294948864 }
  0x4e   :  { %2310 = dma.done.wait [#allocation12], 2048  }
  0x4f   :  { %2311 = vsyncadd [#allocation12], 4294965248  ;;  %v2328_v0 = vmov 0   ;;  %v1936_v1 = vld [vmem:[#allocation5 + $0x24] ss:$16 sps:$4 sm:$0xff]   ;;  %vm184_vm0 = vcmask 261120  }
  0x50   :  { %220 = vmatprep.mubr.bf16.mxu0 %v2328_v0  ;;  %261 = vmatprep.mubr.bf16.mxu1 %v2328_v0  ;;  %v1938_v2 = vld [vmem:[#allocation5 + $0x2c] ss:$16 sps:$4 sm:$0xff]   ;;  %v1940_v3 = vld [vmem:[#allocation5 + $0x20] ss:$16 sps:$4 sm:$0xff]   ;;  %v1941_v4 = vld [vmem:[#allocation5 + $0x28] ss:$16 sps:$4 sm:$0xff]  }
  0x51   :  { %200 = vmatprep.subr.bf16.mxu0 %v1936_v1  ;;  %241 = vmatprep.subr.bf16.mxu1 %v1938_v2  ;;  %v1942_v5 = vld [vmem:[#allocation5 + $0x4] ss:$16 sps:$4 sm:$0xff]   ;;  %v1944_v6 = vld [vmem:[#allocation5 + $0xc] ss:$16 sps:$4 sm:$0xff]   ;;  %v1946_v7 = vld [vmem:[#allocation5] ss:$16 sps:$4 sm:$0xff]  }
  0x52   :  { %201 = vmatpush1.bf16.msra.mxu0 %v1940_v3  ;;  %242 = vmatpush1.bf16.msra.mxu1 %v1941_v4  ;;  %v1947_v8 = vld [vmem:[#allocation5 + $0x8] ss:$16 sps:$4 sm:$0xff]   ;;  %v112_v9 = vld [vmem:[#allocation2] sm:$0x3]  ;;  %v1954_v17 = vld [vmem:[#allocation8 + $0x90] ss:$12 sps:$4 sm:$0xff]  }
  0x53   :  { %202 = vmatprep.subr.bf16.mxu0 %v1942_v5  ;;  %243 = vmatprep.subr.bf16.mxu1 %v1944_v6  ;;  %v1948_v10 = vld [vmem:[#allocation8 + $0xa8] ss:$12 sps:$4 sm:$0xff]   ;;  %v1950_v11 = vld [vmem:[#allocation8 + $0xac] ss:$12 sps:$4 sm:$0xff]   ;;  %v113_v12 = vpack.c.bf16 %v112_v9, %v112_v9  ;;  %v1957_v18 = vld [vmem:[#allocation8 + $0x210] ss:$12 sps:$4 sm:$0xff]  }
  0x54   :  { %v1951_v13 = vld [vmem:[#allocation8 + $0x228] ss:$12 sps:$4 sm:$0xff]   ;;  %v1953_v14 = vld [vmem:[#allocation8 + $0x22c] ss:$12 sps:$4 sm:$0xff]   ;;  %v1968_v23 = vld [vmem:[#allocation8 + $0x64] ss:$12 sps:$4 sm:$0xff]  }
  0x55   :  { %v1956_v15 = vld [vmem:[#allocation8 + $0x94] ss:$12 sps:$4 sm:$0xff]   ;;  %v1962_v19 = vld [vmem:[#allocation8 + $0x7c] ss:$12 sps:$4 sm:$0xff]   ;;  %v1960_v21 = vld [vmem:[#allocation8 + $0x78] ss:$12 sps:$4 sm:$0xff]  }
  0x56   :  { %203 = vmatpush1.bf16.msra.mxu0 %v1946_v7  ;;  %244 = vmatpush1.bf16.msra.mxu1 %v1947_v8  ;;  %v1959_v16 = vld [vmem:[#allocation8 + $0x214] ss:$12 sps:$4 sm:$0xff]   ;;  %v1965_v20 = vld [vmem:[#allocation8 + $0x1fc] ss:$12 sps:$4 sm:$0xff]   ;;  %v1963_v22 = vld [vmem:[#allocation8 + $0x1f8] ss:$12 sps:$4 sm:$0xff]  }
  0x57   :  { %935 = vmatprep.subr.bf16.mxu0 %v1950_v11  ;;  %976 = vmatprep.subr.bf16.mxu1 %v1953_v14  ;;  %v1971_v24 = vld [vmem:[#allocation8 + $0x1e4] ss:$12 sps:$4 sm:$0xff]   ;;  %v1966_v25 = vld [vmem:[#allocation8 + $0x60] ss:$12 sps:$4 sm:$0xff]   ;;  %v1972_v29 = vld [vmem:[#allocation8 + $0x48] ss:$12 sps:$4 sm:$0xff]   ;;  %v124_v14 = vlaneseq }
  0x58   :  { %v1969_v26 = vld [vmem:[#allocation8 + $0x1e0] ss:$12 sps:$4 sm:$0xff]   ;;  %v1975_v30 = vld [vmem:[#allocation8 + $0x1c8] ss:$12 sps:$4 sm:$0xff]   ;;  %v1978_v33 = vld [vmem:[#allocation8 + $0x30] ss:$12 sps:$4 sm:$0xff]  }
  0x59   :  { %1691 = vmatmul.mubr.msk.bf16.vlgmr.msra.gmra.mxu0 %vm184_vm0, %v113_v12  ;;  %1692 = vmatmul.mubr.msk.bf16.vlgmr.msra.gmra.mxu1 %vm184_vm0, %v113_v12  ;;  %v1974_v27 = vld [vmem:[#allocation8 + $0x4c] ss:$12 sps:$4 sm:$0xff]   ;;  %v1980_v31 = vld [vmem:[#allocation8 + $0x34] ss:$12 sps:$4 sm:$0xff]   ;;  %v1981_v34 = vld [vmem:[#allocation8 + $0x1b0] ss:$12 sps:$4 sm:$0xff]  }
  0x5a   :  { %936 = vmatpush1.bf16.msra.mxu0 %v1948_v10  ;;  %977 = vmatpush1.bf16.msra.mxu1 %v1951_v13  ;;  %v1977_v28 = vld [vmem:[#allocation8 + $0x1cc] ss:$12 sps:$4 sm:$0xff]   ;;  %v1983_v32 = vld [vmem:[#allocation8 + $0x1b4] ss:$12 sps:$4 sm:$0xff]   ;;  %v1986_v35 = vld [vmem:[#allocation8 + $0x1c] ss:$12 sps:$4 sm:$0xff]  }
  0x5b   :  { %937 = vmatprep.subr.bf16.mxu0 %v1956_v15  ;;  %978 = vmatprep.subr.bf16.mxu1 %v1959_v16  ;;  %v1989_v36 = vld [vmem:[#allocation8 + $0x19c] ss:$12 sps:$4 sm:$0xff]   ;;  %v1984_v37 = vld [vmem:[#allocation8 + $0x18] ss:$12 sps:$4 sm:$0xff]   ;;  %v1990_v41 = vld [vmem:[#allocation8] ss:$12 sps:$4 sm:$0xff]  }
  0x5c   :  { %v1987_v38 = vld [vmem:[#allocation8 + $0x198] ss:$12 sps:$4 sm:$0xff]   ;;  %v1993_v42 = vld [vmem:[#allocation8 + $0x180] ss:$12 sps:$4 sm:$0xff]   ;;  %v1996_v45 = vld [vmem:[#allocation8 + $0x168] ss:$12 sps:$4 sm:$0xff]  }
  0x5d   :  { %v1992_v39 = vld [vmem:[#allocation8 + $0x4] ss:$12 sps:$4 sm:$0xff]   ;;  %v1998_v43 = vld [vmem:[#allocation8 + $0x16c] ss:$12 sps:$4 sm:$0xff]   ;;  %v1999_v46 = vld [vmem:[#allocation8 + $0x2e8] ss:$12 sps:$4 sm:$0xff]  }
  0x5e   :  { %938 = vmatpush1.bf16.msra.mxu0 %v1954_v17  ;;  %979 = vmatpush1.bf16.msra.mxu1 %v1957_v18  ;;  %v1995_v40 = vld [vmem:[#allocation8 + $0x184] ss:$12 sps:$4 sm:$0xff]   ;;  %v2001_v44 = vld [vmem:[#allocation8 + $0x2ec] ss:$12 sps:$4 sm:$0xff]   ;;  %v2004_v47 = vld [vmem:[#allocation8 + $0x154] ss:$12 sps:$4 sm:$0xff]  }
  0x5f   :  { %939 = vmatprep.subr.bf16.mxu0 %v1962_v19  ;;  %980 = vmatprep.subr.bf16.mxu1 %v1965_v20  ;;  %v2007_v48 = vld [vmem:[#allocation8 + $0x2d4] ss:$12 sps:$4 sm:$0xff]   ;;  %v2002_v49 = vld [vmem:[#allocation8 + $0x150] ss:$12 sps:$4 sm:$0xff]   ;;  %v2008_v53 = vld [vmem:[#allocation8 + $0x138] ss:$12 sps:$4 sm:$0xff]  }
  0x60   :  { %v2005_v50 = vld [vmem:[#allocation8 + $0x2d0] ss:$12 sps:$4 sm:$0xff]   ;;  %v2011_v54 = vld [vmem:[#allocation8 + $0x2b8] ss:$12 sps:$4 sm:$0xff]   ;;  %v2014_v57 = vld [vmem:[#allocation8 + $0x120] ss:$12 sps:$4 sm:$0xff]  }
  0x61   :  { %v2010_v51 = vld [vmem:[#allocation8 + $0x13c] ss:$12 sps:$4 sm:$0xff]   ;;  %v2016_v55 = vld [vmem:[#allocation8 + $0x124] ss:$12 sps:$4 sm:$0xff]   ;;  %v2017_v58 = vld [vmem:[#allocation8 + $0x2a0] ss:$12 sps:$4 sm:$0xff]  }
  0x62   :  { %940 = vmatpush1.bf16.msra.mxu0 %v1960_v21  ;;  %981 = vmatpush1.bf16.msra.mxu1 %v1963_v22  ;;  %v2013_v52 = vld [vmem:[#allocation8 + $0x2bc] ss:$12 sps:$4 sm:$0xff]   ;;  %v2019_v56 = vld [vmem:[#allocation8 + $0x2a4] ss:$12 sps:$4 sm:$0xff]   ;;  %v2022_v59 = vld [vmem:[#allocation8 + $0x10c] ss:$12 sps:$4 sm:$0xff]  }
  0x63   :  { %941 = vmatprep.subr.bf16.mxu0 %v1968_v23  ;;  %982 = vmatprep.subr.bf16.mxu1 %v1971_v24  ;;  %v2025_v60 = vld [vmem:[#allocation8 + $0x28c] ss:$12 sps:$4 sm:$0xff]   ;;  %v2020_v61 = vld [vmem:[#allocation8 + $0x108] ss:$12 sps:$4 sm:$0xff]   ;;  %v2026_v2 = vld [vmem:[#allocation8 + $0xf0] ss:$12 sps:$4 sm:$0xff]  }
  0x64   :  { %v2023_v62 = vld [vmem:[#allocation8 + $0x288] ss:$12 sps:$4 sm:$0xff]   ;;  %v2029_v3 = vld [vmem:[#allocation8 + $0x270] ss:$12 sps:$4 sm:$0xff]   ;;  %v2032_v6 = vld [vmem:[#allocation8 + $0xd8] ss:$12 sps:$4 sm:$0xff]  }
  0x65   :  { %v2028_v63 = vld [vmem:[#allocation8 + $0xf4] ss:$12 sps:$4 sm:$0xff]   ;;  %v2034_v4 = vld [vmem:[#allocation8 + $0xdc] ss:$12 sps:$4 sm:$0xff]   ;;  %v2035_v7 = vld [vmem:[#allocation8 + $0x258] ss:$12 sps:$4 sm:$0xff]  }
  0x66   :  { %942 = vmatpush1.bf16.msra.mxu0 %v1966_v25  ;;  %983 = vmatpush1.bf16.msra.mxu1 %v1969_v26  ;;  %v2031_v1 = vld [vmem:[#allocation8 + $0x274] ss:$12 sps:$4 sm:$0xff]   ;;  %v2037_v5 = vld [vmem:[#allocation8 + $0x25c] ss:$12 sps:$4 sm:$0xff]   ;;  %v2040_v8 = vld [vmem:[#allocation8 + $0xc4] ss:$12 sps:$4 sm:$0xff]  }
  0x67   :  { %943 = vmatprep.subr.bf16.mxu0 %v1974_v27  ;;  %984 = vmatprep.subr.bf16.mxu1 %v1977_v28  ;;  %v2043_v9 = vld [vmem:[#allocation8 + $0x244] ss:$12 sps:$4 sm:$0xff]   ;;  %v2038_v10 = vld [vmem:[#allocation8 + $0xc0] ss:$12 sps:$4 sm:$0xff]   ;;  %v2400_v15 = vshrl.u32 %v124_v14, 7  ;;  %s2329_s24 = smov [#allocation13]  }
  0x68   :  { %v2041_v11 = vld [vmem:[#allocation8 + $0x240] ss:$12 sps:$4 sm:$0xff]   ;;  %v2044_v12 = vld [vmem:[#allocation8 + $0x170] ss:$12 sps:$4 sm:$0xff]   ;;  %s1671_s25 = sshll.u32 %s2329_s24, 4  ;;  %s1672_s25 = int_to_ptr.vmem [resolvable:$true] %s1671_s25 }
  0x69   :  { %v2045_v13 = vld [vmem:[#allocation8 + $0x2f0] ss:$12 sps:$4 sm:$0xff]   ;;  %v2403_v16 = vsub.s32 0, %v2400_v15  ;;  %v134_v17 = vsub.s32 2, %v2400_v15  ;;  %v2407_v19 = vsub.s32 1, %v2400_v15  ;;  %v138_v20 = vsub.s32 3, %v2400_v15  ;;  %p2289_p3 = scmp.lt.s32.totalorder %s1672_s25, %s1672_s25 }
  0x6a   :  { %944 = vmatpush1.bf16.msra.mxu0 %v1972_v29  ;;  %985 = vmatpush1.bf16.msra.mxu1 %v1975_v30  ;;  %v122_v18 = vld [vmem:[#allocation7] sm:$0xf]  ;;  %v2081_v14 = vld [vmem:[#allocation10 + $0x64] ss:$8 sps:$4 sm:$0xff]   ;;  %v2151_v15 = vld [vmem:[#allocation11 + $0x30] sm:$0xff]   ;;  %s2284_s1 = scalar_lea.vmem %s1672_s25, 32 }
  0x6b   :  { %945 = vmatprep.subr.bf16.mxu0 %v1980_v31  ;;  %986 = vmatprep.subr.bf16.mxu1 %v1983_v32  ;;  %v127_v21 = vrot.slane %v122_v18, %v2403_v16  ;;  %v135_v22 = vrot.slane %v122_v18, %v134_v17  ;;  %v131_v23 = vrot.slane %v122_v18, %v2407_v19  ;;  %p2285_p2 = scmp.ne.s32.totalorder %s1672_s25, %s2284_s1  ;;  %p2290_p4 = scmp.lt.s32.totalorder %s2284_s1, %s2284_s1 }
  0x6c   :  { %v139_v24 = vrot.slane %v122_v18, %v138_v20  ;;  %v2079_v18 = vld [vmem:[#allocation10 + $0x60] ss:$8 sps:$4 sm:$0xff]   ;;  %v2084_v20 = vld [vmem:[#allocation10 + $0x54] ss:$8 sps:$4 sm:$0xff]  }
  0x6d   :  { %p2291_p5 = por %p2290_p4, %p2289_p3 }
  0x6e   :  { %946 = vmatpush1.bf16.msra.mxu0 %v1978_v33  ;;  %987 = vmatpush1.bf16.msra.mxu1 %v1981_v34 }
  0x6f   :  { %947 = vmatprep.subr.bf16.mxu0 %v1986_v35  ;;  %988 = vmatprep.subr.bf16.mxu1 %v1989_v36  ;;  %p2292_p6 = pnand %p2291_p5, %p2285_p2 }
  0x72   :  { %948 = vmatpush1.bf16.msra.mxu0 %v1984_v37  ;;  %989 = vmatpush1.bf16.msra.mxu1 %v1987_v38 }
  0x73   :  { %949 = vmatprep.subr.bf16.mxu0 %v1992_v39  ;;  %990 = vmatprep.subr.bf16.mxu1 %v1995_v40 }
  0x76   :  { %950 = vmatpush1.bf16.msra.mxu0 %v1990_v41  ;;  %991 = vmatpush1.bf16.msra.mxu1 %v1993_v42 }
  0x77   :  { %951 = vmatprep.subr.bf16.mxu0 %v1998_v43  ;;  %992 = vmatprep.subr.bf16.mxu1 %v2001_v44  ;;  %v2046_v44 = vld [vmem:[#allocation8 + $0xb0] ss:$12 sps:$4 sm:$0xff]  }
  0x7a   :  { %952 = vmatpush2.bf16.msra.mxu0 %v1996_v45  ;;  %993 = vmatpush2.bf16.msra.mxu1 %v1999_v46  ;;  %v2047_v45 = vld [vmem:[#allocation8 + $0x230] ss:$12 sps:$4 sm:$0xff]  }
  0x7b   :  { %953 = vmatprep.subr.bf16.mxu0 %v2004_v47  ;;  %994 = vmatprep.subr.bf16.mxu1 %v2007_v48  ;;  %v2048_v47 = vld [vmem:[#allocation8 + $0x158] ss:$12 sps:$4 sm:$0xff]  }
  0x7c   :  { %v2049_v48 = vld [vmem:[#allocation8 + $0x2d8] ss:$12 sps:$4 sm:$0xff]  }
  0x7e   :  { %954 = vmatpush2.bf16.msra.mxu0 %v2002_v49  ;;  %995 = vmatpush2.bf16.msra.mxu1 %v2005_v50  ;;  %v2050_v49 = vld [vmem:[#allocation8 + $0x98] ss:$12 sps:$4 sm:$0xff]  }
  0x7f   :  { %955 = vmatprep.subr.bf16.mxu0 %v2010_v51  ;;  %996 = vmatprep.subr.bf16.mxu1 %v2013_v52  ;;  %v2051_v50 = vld [vmem:[#allocation8 + $0x218] ss:$12 sps:$4 sm:$0xff]   ;;  %v2052_v51 = vld [vmem:[#allocation8 + $0x140] ss:$12 sps:$4 sm:$0xff]  }
  0x80   :  { %v2053_v52 = vld [vmem:[#allocation8 + $0x2c0] ss:$12 sps:$4 sm:$0xff]  }
  0x82   :  { %956 = vmatpush2.bf16.msra.mxu0 %v2008_v53  ;;  %997 = vmatpush2.bf16.msra.mxu1 %v2011_v54  ;;  %v2054_v53 = vld [vmem:[#allocation8 + $0x80] ss:$12 sps:$4 sm:$0xff]  }
  0x83   :  { %957 = vmatprep.subr.bf16.mxu0 %v2016_v55  ;;  %998 = vmatprep.subr.bf16.mxu1 %v2019_v56  ;;  %v2055_v54 = vld [vmem:[#allocation8 + $0x200] ss:$12 sps:$4 sm:$0xff]   ;;  %v2056_v55 = vld [vmem:[#allocation8 + $0x128] ss:$12 sps:$4 sm:$0xff]  }
  0x84   :  { %v2057_v56 = vld [vmem:[#allocation8 + $0x2a8] ss:$12 sps:$4 sm:$0xff]  }
  0x86   :  { %958 = vmatpush2.bf16.msra.mxu0 %v2014_v57  ;;  %999 = vmatpush2.bf16.msra.mxu1 %v2017_v58  ;;  %v2058_v57 = vld [vmem:[#allocation8 + $0x68] ss:$12 sps:$4 sm:$0xff]  }
  0x87   :  { %959 = vmatprep.subr.bf16.mxu0 %v2022_v59  ;;  %1000 = vmatprep.subr.bf16.mxu1 %v2025_v60  ;;  %v2059_v58 = vld [vmem:[#allocation8 + $0x1e8] ss:$12 sps:$4 sm:$0xff]   ;;  %v2060_v59 = vld [vmem:[#allocation8 + $0x110] ss:$12 sps:$4 sm:$0xff]  }
  0x88   :  { %v2061_v60 = vld [vmem:[#allocation8 + $0x290] ss:$12 sps:$4 sm:$0xff]  }
  0x8a   :  { %960 = vmatpush2.bf16.msra.mxu0 %v2020_v61  ;;  %1001 = vmatpush2.bf16.msra.mxu1 %v2023_v62  ;;  %v2062_v61 = vld [vmem:[#allocation8 + $0x50] ss:$12 sps:$4 sm:$0xff]  }
  0x8b   :  { %961 = vmatprep.subr.bf16.mxu0 %v2028_v63  ;;  %1002 = vmatprep.subr.bf16.mxu1 %v2031_v1  ;;  %v2063_v62 = vld [vmem:[#allocation8 + $0x1d0] ss:$12 sps:$4 sm:$0xff]   ;;  %v2064_v63 = vld [vmem:[#allocation8 + $0xf8] ss:$12 sps:$4 sm:$0xff]  }
  0x8c   :  { %v2065_v1 = vld [vmem:[#allocation8 + $0x278] ss:$12 sps:$4 sm:$0xff]  }
  0x8e   :  { %962 = vmatpush2.bf16.msra.mxu0 %v2026_v2  ;;  %1003 = vmatpush2.bf16.msra.mxu1 %v2029_v3  ;;  %v2066_v2 = vld [vmem:[#allocation8 + $0x38] ss:$12 sps:$4 sm:$0xff]  }
  0x8f   :  { %963 = vmatprep.subr.bf16.mxu0 %v2034_v4  ;;  %1004 = vmatprep.subr.bf16.mxu1 %v2037_v5  ;;  %v2067_v3 = vld [vmem:[#allocation8 + $0x1b8] ss:$12 sps:$4 sm:$0xff]   ;;  %v2068_v4 = vld [vmem:[#allocation8 + $0xe0] ss:$12 sps:$4 sm:$0xff]  }
  0x90   :  { %v2069_v5 = vld [vmem:[#allocation8 + $0x260] ss:$12 sps:$4 sm:$0xff]  }
  0x92   :  { %964 = vmatpush2.bf16.msra.mxu0 %v2032_v6  ;;  %1005 = vmatpush2.bf16.msra.mxu1 %v2035_v7  ;;  %v2070_v6 = vld [vmem:[#allocation8 + $0x20] ss:$12 sps:$4 sm:$0xff]  }
  0x93   :  { %965 = vmatprep.subr.bf16.mxu0 %v2040_v8  ;;  %1006 = vmatprep.subr.bf16.mxu1 %v2043_v9  ;;  %v2071_v7 = vld [vmem:[#allocation8 + $0x1a0] ss:$12 sps:$4 sm:$0xff]   ;;  %v2072_v8 = vld [vmem:[#allocation8 + $0xc8] ss:$12 sps:$4 sm:$0xff]  }
  0x94   :  { %v2073_v9 = vld [vmem:[#allocation8 + $0x248] ss:$12 sps:$4 sm:$0xff]  }
  0x96   :  { %966 = vmatpush2.bf16.msra.mxu0 %v2038_v10  ;;  %1007 = vmatpush2.bf16.msra.mxu1 %v2041_v11  ;;  %v2074_v10 = vld [vmem:[#allocation8 + $0x8] ss:$12 sps:$4 sm:$0xff]  }
  0x97   :  { %1854 = vmatprep.subr.bf16.mxu0 %v2044_v12  ;;  %1876 = vmatprep.subr.bf16.mxu1 %v2045_v13  ;;  %v2075_v11 = vld [vmem:[#allocation8 + $0x188] ss:$12 sps:$4 sm:$0xff]   ;;  %v2076_v13 = vld [vmem:[#allocation10 + $0x70] ss:$8 sps:$4 sm:$0xff]  }
  0x98   :  { %v2078_v12 = vld [vmem:[#allocation10 + $0x74] ss:$8 sps:$4 sm:$0xff]  }
 0x119   :  { %v222_v25 = vpop.f32.mrf.mxu0  ;;  %v263_v26 = vpop.f32.mrf.mxu1 }
 0x11a   :  { %v223_v27 = vadd.f32 %v222_v25, %v127_v21  ;;  %v264_v28 = vadd.f32 %v263_v26, %v135_v22  ;;  %v2082_v21 = vld [vmem:[#allocation10 + $0x50] ss:$8 sps:$4 sm:$0xff]   ;;  %v2087_v22 = vld [vmem:[#allocation10 + $0x44] ss:$8 sps:$4 sm:$0xff]  }
 0x11b   :  { %v224_v29 = vpop.f32.mrf.mxu0  ;;  %v265_v30 = vpop.f32.mrf.mxu1  ;;  %v2088_v25 = vld [vmem:[#allocation10 + $0x30] ss:$8 sps:$4 sm:$0xff]   ;;  %v2093_v26 = vld [vmem:[#allocation10 + $0x24] ss:$8 sps:$4 sm:$0xff]  }
 0x11c   :  { %v272_v31 = vmax.f32 %v264_v28, 0.0  ;;  %v225_v32 = vadd.f32 %v224_v29, %v131_v23  ;;  %v266_v33 = vadd.f32 %v265_v30, %v139_v24  ;;  %v270_v34 = vmax.f32 %v223_v27, 0.0  ;;  %v2085_v23 = vld [vmem:[#allocation10 + $0x40] ss:$8 sps:$4 sm:$0xff]   ;;  %v2090_v24 = vld [vmem:[#allocation10 + $0x34] ss:$8 sps:$4 sm:$0xff]  }
 0x11d   :  { %v226_v35 = vpop.f32.mrf.mxu0  ;;  %v267_v36 = vpop.f32.mrf.mxu1  ;;  %v2091_v27 = vld [vmem:[#allocation10 + $0x20] ss:$8 sps:$4 sm:$0xff]   ;;  %v2096_v28 = vld [vmem:[#allocation10 + $0x14] ss:$8 sps:$4 sm:$0xff]   ;;  %v2099_v29 = vld [vmem:[#allocation10 + $0x4] ss:$8 sps:$4 sm:$0xff]  }
 0x11e   :  { %v271_v37 = vmax.f32 %v225_v32, 0.0  ;;  %v273_v38 = vmax.f32 %v266_v33, 0.0  ;;  %v2414_v39 = vpack.c.bf16 %v272_v31, %v272_v31  ;;  %v2416_v46 = vpack.c.bf16 %v270_v34, %v270_v34  ;;  %v2097_v30 = vld [vmem:[#allocation10] ss:$8 sps:$4 sm:$0xff]   ;;  %v2102_v31 = vld [vmem:[#allocation10 + $0xf4] ss:$8 sps:$4 sm:$0xff]  }
 0x11f   :  { %v227_v40 = vpop.f32.mrf.mxu0  ;;  %v268_v41 = vpop.f32.mrf.mxu1  ;;  %v2100_v32 = vld [vmem:[#allocation10 + $0xf0] ss:$8 sps:$4 sm:$0xff]   ;;  %v2105_v33 = vld [vmem:[#allocation10 + $0xe4] ss:$8 sps:$4 sm:$0xff]   ;;  %v2103_v34 = vld [vmem:[#allocation10 + $0xe0] ss:$8 sps:$4 sm:$0xff]  }
 0x120   :  { %v275_v42 = vpack.c.bf16 %v271_v37, %v271_v37  ;;  %v277_v43 = vpack.c.bf16 %v273_v38, %v273_v38  ;;  %v2108_v35 = vld [vmem:[#allocation10 + $0xd4] ss:$8 sps:$4 sm:$0xff]   ;;  %v2106_v36 = vld [vmem:[#allocation10 + $0xd0] ss:$8 sps:$4 sm:$0xff]   ;;  %v2111_v37 = vld [vmem:[#allocation10 + $0xc4] ss:$8 sps:$4 sm:$0xff]  }
 0x121   :  { %v2109_v38 = vld [vmem:[#allocation10 + $0xc0] ss:$8 sps:$4 sm:$0xff]   ;;  %v2126_v40 = vld [vmem:[#allocation10 + $0x174] ss:$8 sps:$4 sm:$0xff]   ;;  %v2124_v41 = vld [vmem:[#allocation10 + $0x170] ss:$8 sps:$4 sm:$0xff]  }
 0x122   :  { %967 = vmatprep.mubr.bf16.mxu0 %v275_v42  ;;  %1008 = vmatprep.mubr.bf16.mxu1 %v277_v43 }
 0x123   :  { %968 = vmatmul.mubr.bf16.vlgmr.msra.gmra.mxu0 %v2416_v46  ;;  %1009 = vmatmul.mubr.bf16.vlgmr.msra.gmra.mxu1 %v2414_v39 }
 0x124   :  { %1855 = vmatpush3.bf16.msra.mxu0 %v2046_v44  ;;  %1877 = vmatpush3.bf16.msra.mxu1 %v2047_v45  ;;  %v2117_v44 = vld [vmem:[#allocation10 + $0xa4] ss:$8 sps:$4 sm:$0xff]   ;;  %v2127_v45 = vld [vmem:[#allocation10 + $0x160] ss:$8 sps:$4 sm:$0xff]  }
 0x125   :  { %1049 = vmatprep.mubr.bf16.mxu0 %v275_v42  ;;  %1089 = vmatprep.mubr.bf16.mxu1 %v277_v43  ;;  %v2129_v42 = vld [vmem:[#allocation10 + $0x164] ss:$8 sps:$4 sm:$0xff]   ;;  %v2112_v43 = vld [vmem:[#allocation10 + $0xb0] ss:$8 sps:$4 sm:$0xff]  }
 0x126   :  { %1856 = vmatprep.subr.bf16.mxu0 %v2048_v47  ;;  %1878 = vmatprep.subr.bf16.mxu1 %v2049_v48  ;;  %v2115_v47 = vld [vmem:[#allocation10 + $0xa0] ss:$8 sps:$4 sm:$0xff]   ;;  %v2120_v48 = vld [vmem:[#allocation10 + $0x94] ss:$8 sps:$4 sm:$0xff]  }
 0x128   :  { %1857 = vmatpush3.bf16.msra.mxu0 %v2050_v49  ;;  %1879 = vmatpush3.bf16.msra.mxu1 %v2051_v50  ;;  %v2130_v49 = vld [vmem:[#allocation10 + $0x150] ss:$8 sps:$4 sm:$0xff]   ;;  %v2135_v50 = vld [vmem:[#allocation10 + $0x144] ss:$8 sps:$4 sm:$0xff]  }
 0x129   :  { %1858 = vmatprep.subr.bf16.mxu0 %v2052_v51  ;;  %1880 = vmatprep.subr.bf16.mxu1 %v2053_v52  ;;  %v2118_v51 = vld [vmem:[#allocation10 + $0x90] ss:$8 sps:$4 sm:$0xff]   ;;  %v2123_v52 = vld [vmem:[#allocation10 + $0x84] ss:$8 sps:$4 sm:$0xff]  }
 0x12c   :  { %1859 = vmatpush3.bf16.msra.mxu0 %v2054_v53  ;;  %1881 = vmatpush3.bf16.msra.mxu1 %v2055_v54  ;;  %v2133_v53 = vld [vmem:[#allocation10 + $0x140] ss:$8 sps:$4 sm:$0xff]   ;;  %v2138_v54 = vld [vmem:[#allocation10 + $0x134] ss:$8 sps:$4 sm:$0xff]  }
 0x12d   :  { %1860 = vmatprep.subr.bf16.mxu0 %v2056_v55  ;;  %1882 = vmatprep.subr.bf16.mxu1 %v2057_v56  ;;  %v2121_v55 = vld [vmem:[#allocation10 + $0x80] ss:$8 sps:$4 sm:$0xff]   ;;  %v2136_v56 = vld [vmem:[#allocation10 + $0x130] ss:$8 sps:$4 sm:$0xff]  }
 0x130   :  { %1861 = vmatpush3.bf16.msra.mxu0 %v2058_v57  ;;  %1883 = vmatpush3.bf16.msra.mxu1 %v2059_v58  ;;  %v2141_v57 = vld [vmem:[#allocation10 + $0x124] ss:$8 sps:$4 sm:$0xff]   ;;  %v2139_v58 = vld [vmem:[#allocation10 + $0x120] ss:$8 sps:$4 sm:$0xff]  }
 0x131   :  { %1862 = vmatprep.subr.bf16.mxu0 %v2060_v59  ;;  %1884 = vmatprep.subr.bf16.mxu1 %v2061_v60  ;;  %v2144_v59 = vld [vmem:[#allocation10 + $0x114] ss:$8 sps:$4 sm:$0xff]   ;;  %v2142_v60 = vld [vmem:[#allocation10 + $0x110] ss:$8 sps:$4 sm:$0xff]  }
 0x134   :  { %1863 = vmatpush3.bf16.msra.mxu0 %v2062_v61  ;;  %1885 = vmatpush3.bf16.msra.mxu1 %v2063_v62  ;;  %v2147_v61 = vld [vmem:[#allocation10 + $0x104] ss:$8 sps:$4 sm:$0xff]   ;;  %v2145_v62 = vld [vmem:[#allocation10 + $0x100] ss:$8 sps:$4 sm:$0xff]  }
 0x135   :  { %1864 = vmatprep.subr.bf16.mxu0 %v2064_v63  ;;  %1886 = vmatprep.subr.bf16.mxu1 %v2065_v1  ;;  %v406_v63 = vld [vmem:[%s2445_s4] sm:$0x7] }
 0x136   :  { %v411_v1 = vrot.slane %v406_v63, %v2403_v16 }
 0x138   :  { %1865 = vmatpush3.bf16.msra.mxu0 %v2066_v2  ;;  %1887 = vmatpush3.bf16.msra.mxu1 %v2067_v3  ;;  %v415_v2 = vrot.slane %v406_v63, %v2407_v19 }
 0x139   :  { %1866 = vmatprep.subr.bf16.mxu0 %v2068_v4  ;;  %1888 = vmatprep.subr.bf16.mxu1 %v2069_v5 }
 0x13c   :  { %1867 = vmatpush3.bf16.msra.mxu0 %v2070_v6  ;;  %1889 = vmatpush3.bf16.msra.mxu1 %v2071_v7 }
 0x13d   :  { %1868 = vmatprep.subr.bf16.mxu0 %v2072_v8  ;;  %1890 = vmatprep.subr.bf16.mxu1 %v2073_v9 }
 0x140   :  { %1869 = vmatpush3.bf16.msra.mxu0 %v2074_v10  ;;  %1891 = vmatpush3.bf16.msra.mxu1 %v2075_v11 }
 0x141   :  { %1403 = vmatprep.subr.bf16.mxu0 %v2078_v12  ;;  %1444 = vmatprep.subr.bf16.mxu1 %v2126_v40  ;;  %v2153_v40 = vld [vmem:[#allocation11 + $0x28] sm:$0xff]  }
 0x143   :  { %1050 = vmatmul.mubr.bf16.vlgmr.msra.gmra.mxu0 %v2416_v46  ;;  %1090 = vmatmul.mubr.bf16.vlgmr.msra.gmra.mxu1 %v2414_v39  ;;  %v2114_v39 = vld [vmem:[#allocation10 + $0xb4] ss:$8 sps:$4 sm:$0xff]  }
 0x144   :  { %1404 = vmatpush1.bf16.msra.mxu0 %v2076_v13  ;;  %1476 = vmatprep.mubr.bf16.mxu1 %v2328_v0  ;;  %v2094_v0 = vld [vmem:[#allocation10 + $0x10] ss:$8 sps:$4 sm:$0xff]   ;;  %v2132_v46 = vld [vmem:[#allocation10 + $0x154] ss:$8 sps:$4 sm:$0xff]  }
 0x145   :  { %1405 = vmatprep.subr.bf16.mxu0 %v2081_v14  ;;  %1445 = vmatpush1.bf16.msra.mxu1 %v2124_v41  ;;  %v2154_v41 = vld [vmem:[#allocation11 + $0x60] sm:$0xff]  }
 0x146   :  { %1446 = vmatprep.subr.bf16.mxu1 %v2129_v42  ;;  %v2155_v42 = vld [vmem:[#allocation11 + $0x20] sm:$0xff]  }
 0x148   :  { %1406 = vmatpush1.bf16.msra.mxu0 %v2079_v18 }
 0x149   :  { %1407 = vmatprep.subr.bf16.mxu0 %v2084_v20  ;;  %1447 = vmatpush1.bf16.msra.mxu1 %v2127_v45  ;;  %v2158_v45 = vld [vmem:[#allocation11 + $0x50] sm:$0xff]  }
 0x14a   :  { %1448 = vmatprep.subr.bf16.mxu1 %v2132_v46  ;;  %v2159_v46 = vld [vmem:[#allocation11 + $0x10] sm:$0xff]  }
 0x14c   :  { %1408 = vmatpush1.bf16.msra.mxu0 %v2082_v21 }
 0x14d   :  { %1409 = vmatprep.subr.bf16.mxu0 %v2087_v22  ;;  %1449 = vmatpush1.bf16.msra.mxu1 %v2130_v49  ;;  %v2162_v49 = vld [vmem:[#allocation11 + $0x40] sm:$0xff]  }
 0x14e   :  { %1450 = vmatprep.subr.bf16.mxu1 %v2135_v50  ;;  %v2163_v50 = vld [vmem:[#allocation11] sm:$0xff]  }
 0x150   :  { %1410 = vmatpush1.bf16.msra.mxu0 %v2085_v23 }
 0x151   :  { %1411 = vmatprep.subr.bf16.mxu0 %v2090_v24  ;;  %1451 = vmatpush1.bf16.msra.mxu1 %v2133_v53 }
 0x152   :  { %1452 = vmatprep.subr.bf16.mxu1 %v2138_v54 }
 0x154   :  { %1412 = vmatpush1.bf16.msra.mxu0 %v2088_v25  ;;  %v419_v25 = vrot.slane %v406_v63, %v134_v17  ;;  %v2152_v17 = vld [vmem:[#allocation11 + $0x68] sm:$0xff]  }
 0x155   :  { %1413 = vmatprep.subr.bf16.mxu0 %v2093_v26  ;;  %1453 = vmatpush1.bf16.msra.mxu1 %v2136_v56 }
 0x156   :  { %1454 = vmatprep.subr.bf16.mxu1 %v2141_v57 }
 0x158   :  { %1414 = vmatpush1.bf16.msra.mxu0 %v2091_v27 }
 0x159   :  { %1415 = vmatprep.subr.bf16.mxu0 %v2096_v28  ;;  %1455 = vmatpush1.bf16.msra.mxu1 %v2139_v58 }
 0x15a   :  { %1456 = vmatprep.subr.bf16.mxu1 %v2144_v59 }
 0x15c   :  { %1416 = vmatpush1.bf16.msra.mxu0 %v2094_v0 }
 0x15d   :  { %1417 = vmatprep.subr.bf16.mxu0 %v2099_v29  ;;  %1457 = vmatpush1.bf16.msra.mxu1 %v2142_v60 }
 0x15e   :  { %1458 = vmatprep.subr.bf16.mxu1 %v2147_v61 }
 0x160   :  { %1418 = vmatpush1.bf16.msra.mxu0 %v2097_v30 }
 0x161   :  { %1419 = vmatprep.subr.bf16.mxu0 %v2102_v31  ;;  %1459 = vmatpush1.bf16.msra.mxu1 %v2145_v62 }
 0x164   :  { %1420 = vmatpush2.bf16.msra.mxu0 %v2100_v32 }
 0x165   :  { %1421 = vmatprep.subr.bf16.mxu0 %v2105_v33 }
 0x168   :  { %1422 = vmatpush2.bf16.msra.mxu0 %v2103_v34 }
 0x169   :  { %1423 = vmatprep.subr.bf16.mxu0 %v2108_v35 }
 0x16c   :  { %1424 = vmatpush2.bf16.msra.mxu0 %v2106_v36 }
 0x16d   :  { %1425 = vmatprep.subr.bf16.mxu0 %v2111_v37  ;;  %v2148_v37 = vld [vmem:[#allocation11 + $0x78] sm:$0xff]  }
 0x16e   :  { %1898 = vmatprep.subr.bf16.mxu1 %v2148_v37 }
 0x170   :  { %1426 = vmatpush2.bf16.msra.mxu0 %v2109_v38  ;;  %v2149_v38 = vld [vmem:[#allocation11 + $0x38] sm:$0xff]  }
 0x171   :  { %1427 = vmatprep.subr.bf16.mxu0 %v2114_v39  ;;  %v2150_v39 = vld [vmem:[#allocation11 + $0x70] sm:$0xff]  }
 0x174   :  { %1428 = vmatpush2.bf16.msra.mxu0 %v2112_v43  ;;  %v2156_v43 = vld [vmem:[#allocation11 + $0x58] sm:$0xff]  }
 0x175   :  { %1429 = vmatprep.subr.bf16.mxu0 %v2117_v44  ;;  %v2157_v44 = vld [vmem:[#allocation11 + $0x18] sm:$0xff]  }
 0x178   :  { %1430 = vmatpush2.bf16.msra.mxu0 %v2115_v47  ;;  %v2160_v47 = vld [vmem:[#allocation11 + $0x48] sm:$0xff]  }
 0x179   :  { %1431 = vmatprep.subr.bf16.mxu0 %v2120_v48  ;;  %v2161_v48 = vld [vmem:[#allocation11 + $0x8] sm:$0xff]  }
 0x17c   :  { %1432 = vmatpush2.bf16.msra.mxu0 %v2118_v51 }
 0x17d   :  { %1433 = vmatprep.subr.bf16.mxu0 %v2123_v52 }
 0x180   :  { %1434 = vmatpush2.bf16.msra.mxu0 %v2121_v55  ;;  %v1151_v55 = vld [vmem:[%s2447_s6] sm:$0x3] }
 0x181   :  { %v1156_v56 = vrot.slane %v1151_v55, %v2403_v16  ;;  %v1160_v57 = vrot.slane %v1151_v55, %v2407_v19  ;;  %v1837_v16 = vld [vmem:[%s2449_s8] ss:$0 sm:$0xff] }
 0x1e3   :  { %v969_v3 = vpop.f32.mrf.mxu0  ;;  %v1010_v4 = vpop.f32.mrf.mxu1 }
 0x1e4   :  { %v970_v5 = vadd.f32 %v969_v3, %v411_v1 }
 0x1e5   :  { %v971_v6 = vpop.f32.mrf.mxu0  ;;  %v1012_v7 = vpop.f32.mrf.mxu1 }
 0x1e6   :  { %v1011_v8 = vadd.f32 %v1010_v4, %v970_v5  ;;  %v972_v9 = vadd.f32 %v971_v6, %v415_v2 }
 0x1e7   :  { %v973_v10 = vpop.f32.mrf.mxu0  ;;  %v1014_v11 = vpop.f32.mrf.mxu1 }
 0x1e8   :  { %v1013_v12 = vadd.f32 %v1012_v7, %v972_v9  ;;  %v1097_v13 = vmax.f32 %v1011_v8, 0.0 }
 0x1e9   :  { %v974_v14 = vpop.f32.mrf.mxu0  ;;  %v1015_v18 = vpop.f32.mrf.mxu1 }
 0x1ea   :  { %v1098_v20 = vmax.f32 %v1013_v12, 0.0  ;;  %v1100_v22 = vpack.c.bf16 %v1097_v13, %v1097_v13 }
 0x1ec   :  { %v1101_v21 = vpack.c.bf16 %v1098_v20, %v1098_v20 }
 0x1ee   :  { %1435 = vmatprep.mubr.bf16.mxu0 %v1101_v21 }
 0x1ef   :  { %1436 = vmatmul.mubr.bf16.vlgmr.msra.gmra.mxu0 %v1100_v22 }
 0x203   :  { %v1870_v23 = vpop.f32.mrf.mxu0  ;;  %v1892_v24 = vpop.f32.mrf.mxu1 }
 0x205   :  { %v1871_v26 = vpop.f32.mrf.mxu0  ;;  %v1893_v27 = vpop.f32.mrf.mxu1 }
 0x206   :  { %v1872_v28 = vadd.f32 %v1871_v26, %v1870_v23  ;;  %v1894_v31 = vadd.f32 %v1893_v27, %v1892_v24 }
 0x207   :  { %v1873_v0 = vpop.f32.mrf.mxu0  ;;  %v1895_v29 = vpop.f32.mrf.mxu1 }
 0x208   :  { %v1052_v30 = vadd.f32 %v1872_v28, %v419_v25 }
 0x209   :  { %v1874_v32 = vpop.f32.mrf.mxu0  ;;  %v1896_v33 = vpop.f32.mrf.mxu1 }
 0x20a   :  { %v1092_v34 = vadd.f32 %v1894_v31, %v1052_v30 }
 0x20c   :  { %v1099_v35 = vmax.f32 %v1092_v34, 0.0 }
 0x20e   :  { %v1102_v36 = vpack.c.bf16 %v1099_v35, %v1099_v35 }
 0x210   :  { %1477 = vmatmul.mubr.bf16.vlgmr.msra.gmra.mxu1 %v1102_v36 }
 0x211   :  { %1899 = vmatpush3.bf16.msra.mxu1 %v2149_v38 }
 0x212   :  { %1900 = vmatprep.subr.bf16.mxu1 %v2150_v39 }
 0x215   :  { %1901 = vmatpush3.bf16.msra.mxu1 %v2151_v15 }
 0x216   :  { %1902 = vmatprep.subr.bf16.mxu1 %v2152_v17 }
 0x219   :  { %1903 = vmatpush3.bf16.msra.mxu1 %v2153_v40 }
 0x21a   :  { %1904 = vmatprep.subr.bf16.mxu1 %v2154_v41 }
 0x21d   :  { %1905 = vmatpush3.bf16.msra.mxu1 %v2155_v42 }
 0x21e   :  { %1906 = vmatprep.subr.bf16.mxu1 %v2156_v43 }
 0x221   :  { %1907 = vmatpush3.bf16.msra.mxu1 %v2157_v44 }
 0x222   :  { %1908 = vmatprep.subr.bf16.mxu1 %v2158_v45 }
 0x225   :  { %1909 = vmatpush3.bf16.msra.mxu1 %v2159_v46 }
 0x226   :  { %1910 = vmatprep.subr.bf16.mxu1 %v2160_v47 }
 0x229   :  { %1911 = vmatpush3.bf16.msra.mxu1 %v2161_v48 }
 0x22a   :  { %1912 = vmatprep.subr.bf16.mxu1 %v2162_v49 }
 0x22d   :  { %1913 = vmatpush3.bf16.msra.mxu1 %v2163_v50 }
 0x2af   :  { %v1437_v51 = vpop.f32.mrf.mxu0 }
 0x2b0   :  { %v1438_v58 = vadd.f32 %v1437_v51, %v1156_v56 }
 0x2b1   :  { %v1439_v52 = vpop.f32.mrf.mxu0 }
 0x2b2   :  { %v1440_v60 = vadd.f32 %v1439_v52, %v1160_v57 }
 0x2b3   :  { %v1441_v53 = vpop.f32.mrf.mxu0 }
 0x2b5   :  { %v1442_v54 = vpop.f32.mrf.mxu0 }
 0x2d0   :  { %v1478_v59 = vpop.f32.mrf.mxu1 }
 0x2d1   :  { %v1479_v61 = vadd.f32 %v1478_v59, %v1438_v58 }
 0x2d2   :  { %v1480_v62 = vpop.f32.mrf.mxu1 }
 0x2d3   :  { %v1481_v63 = vadd.f32 %v1480_v62, %v1440_v60  ;;  %v1485_v1 = vmax.f32 %v1479_v61, 0.0 }
 0x2d4   :  { %v1482_v2 = vpop.f32.mrf.mxu1 }
 0x2d5   :  { %v1486_v3 = vmax.f32 %v1481_v63, 0.0  ;;  %v1487_v6 = vpack.c.bf16 %v1485_v1, %v1485_v1 }
 0x2d6   :  { %v1483_v4 = vpop.f32.mrf.mxu1 }
 0x2d7   :  { %v1488_v5 = vpack.c.bf16 %v1486_v3, %v1486_v3 }
 0x2d9   :  { %1656 = vmatprep.mubr.bf16.mxu1 %v1488_v5 }
 0x2da   :  { %1657 = vmatmul.mubr.bf16.vlgmr.msra.gmra.mxu1 %v1487_v6 }
 0x39a   :  { %v1914_v7 = vpop.f32.mrf.mxu1 }
 0x39c   :  { %v1915_v19 = vpop.f32.mrf.mxu1 }
 0x39d   :  { %v1916_v8 = vadd.f32 %v1915_v19, %v1914_v7 }
 0x39e   :  { %v1917_v9 = vpop.f32.mrf.mxu1 }
 0x39f   :  { %v1659_v10 = vadd.f32 %v1916_v8, %v1837_v16 }
 0x3a0   :  { %v1918_v11 = vpop.f32.mrf.mxu1 }
 0x3a1   :  { %1664 = vst [vmem:[#allocation13] sm:$0x3] %v1659_v10 }
 0x3a2   :  { %2295 = shalt.err (!%p2292_p6)
}
 0x3a3   :  { %1674 = dma.vmem_to_hbm [thread:$0]  %s1672_s25, 32, %s2450_s9, [#allocation4]  }
 0x3a4   :  { %2312 = dma.done.wait [#allocation4], 32  }
 0x3a5   :  { %2313 = vsyncadd [#allocation4], 4294967264 }
 0x3a6   :  { %1678 = vsyncpa [#allocation3], 1 }
 0x3a7   :  { %1679 = vsyncpa [#allocation6], 1 }
 0x3a8   :  { %1680 = vsyncpa [#allocation9], 1 }
 0x3a9   :  { %1681 = vsyncpa [#allocation12], 1 }
 0x3aa   :  { %1682 = vsyncpa [#allocation4], 1 }

</bundles_post_ra>
